<compile_context>
chip_gen: v6e
topology: v6e:2x2x1
jax: 0.10.0
libtpu: 0.0.40
codegen_flags: <defaults>
</compile_context>

<pallas_src>
import functools

import jax
import jax.numpy as jnp
from jax.experimental import pallas as pl
from jax.experimental.pallas import tpu as pltpu


def _graph_learn_kernel(xrow_ref, xcol_ref, p_ref, a_ref, s_ref, loss_ref, *,
                        V, bn, inv_n, alpha):
    # xrow_ref: (1, F, bn*V)   xrow[k, b*V+j] = x[b, j, k]   (row operand)
    # xcol_ref: (1, F*V, bn)   xcol[k*V+i, b] = x[b, i, k]   (unreplicated column operand)
    # p_ref   : (bn, bn*V)     P[b, b'*V+j]   = (b == b')    (lane-group replication matrix)
    # a_ref   : (F,) in SMEM   per-feature learnable weights (read as scalars)
    # s_ref   : (1, V, bn*V)   packed adjacency: S_packed[i, b*V+j] = S[b, i, j]
    # loss_ref: (1, 8, 128)    per-block loss partial, one unmasked lane-dense store
    Fdim = xrow_ref.shape[1]
    bnV = bn * V

    xrow = xrow_ref[...][0]                                     # (F, bnV)
    xcol = xcol_ref[...][0]                                     # (F*V, bn)

    # Replicate the column operand along lane groups with ONE small MXU matmul:
    #   cr[k*V + i, b*V + j] = x[b, i, k]
    cr = jnp.dot(xcol, p_ref[...], preferred_element_type=jnp.float32)   # (F*V, bnV)

    # Weighted-L1 affinity d1 and squared distance d2, accumulated feature-by-
    # feature on lane-dense (V, bn*V) VPU tiles.  d2 reuses the diff (no Gram
    # matrix, no r_i + r_j - 2G cancellation).
    d1 = jnp.zeros((V, bnV), jnp.float32)
    d2 = jnp.zeros((V, bnV), jnp.float32)
    # TODO(synk): switch to lax.fori_loop with a small unroll (and per-iteration
    # ref slices) if F grows beyond ~32; at F=8 the static unroll is best.
    for k in range(Fdim):
        col = cr[k * V:(k + 1) * V, :]                          # (V, bnV): x[b, i, k]
        row = xrow[k:k + 1, :]                                  # (1, bnV): x[b, j, k]
        diff = col - row
        # NOTE: a_k is not folded into col/row: a_k*|d| != |a_k*d| for a_k < 0.
        d1 = d1 + a_ref[k] * jnp.abs(diff)
        d2 = d2 + diff * diff

    tmpS = jnp.exp(-jnp.maximum(d1, 0.0))                       # exp(-relu(.)) on EUP
    # torch.sum(tmpS, axis=1, keepdims=True): normalize over vertex index i,
    # which is the sublane axis of the packed tile.
    colsum = jnp.sum(tmpS, axis=0, keepdims=True)               # (1, bnV)
    inv = pl.reciprocal(colsum, approx=True)                    # EUP, off the VALU
    inv = inv * (2.0 - colsum * inv)                            # one Newton step -> ~exact
    S = tmpS * inv
    s_ref[...] = S.reshape(1, V, bnV).astype(s_ref.dtype)       # lane-dense store

    # F_norm_loss (3-D branch): sum_ij mean_n S^2                      -> ss / N
    # diff_loss   (3-D branch): alpha * sum(matmul(S, sum_j diff^2))
    #                         = alpha * sum_b sum_j (sum_i S[i,j]) * (sum_i d2[i,j])
    ss = jnp.sum(jnp.sum(S * S, axis=1, keepdims=True), axis=0, keepdims=True)  # (1, 1)
    q = jnp.sum(d2, axis=0, keepdims=True)                      # (1, bnV)
    s_col = jnp.sum(S, axis=0, keepdims=True)                   # (1, bnV)
    dd = jnp.sum(q * s_col, axis=1, keepdims=True)              # (1, 1)

    partial = ss * inv_n + alpha * dd                           # (1, 1)
    loss_ref[...] = jnp.broadcast_to(partial, (1, 8, 128))      # one unmasked store


def _pick_batch_block(N, V, Fdim):
    """Largest divisor bn of N whose per-step working set fits the VMEM budget,
    keeping nb >= 2 when possible so v7x can shard the grid over both cores."""
    try:
        vmem_bytes = int(pltpu.get_tpu_info().vmem_capacity_bytes)
    except Exception:  # conservative fallback if the query is unavailable
        vmem_bytes = 64 * 1024 * 1024
    # Stay well under the default 32 MiB scoped-vmem limit (and v7x's 64 MiB).
    budget = min(vmem_bytes // 2, 24 * 1024 * 1024)

    def footprint(bn):
        bnV = bn * V
        live = 4 * (Fdim * V * bnV + 8 * V * bnV)                         # cr + f32 temps
        io = 2 * 4 * (Fdim * bnV + Fdim * V * bn + V * bnV + 8 * 128)     # dbl-buffered blocks
        return live + io

    best = 1
    for d in range(1, N + 1):
        if N % d:
            continue
        if N >= 2 and N // d < 2:        # keep >= 2 grid steps (v7x megacore)
            continue
        if footprint(d) > budget:
            continue
        best = d
    return best, footprint(best)


def graph_learn_forward(x, a, alpha):
    """x: (N, V, F) float32, a: (F, 1) float32. Returns (S, ajloss)."""
    N, V, Fdim = x.shape
    a_vec = a.reshape(Fdim).astype(jnp.float32)

    bn, est = _pick_batch_block(N, V, Fdim)
    nb = N // bn
    bnV = bn * V

    # Wrapper-side relayouts: pack bn batch elements onto the lane axis.
    x4 = x.reshape(nb, bn, V, Fdim)
    x_row = jnp.transpose(x4, (0, 3, 1, 2)).reshape(nb, Fdim, bnV)      # [k, b*V+j] = x[b,j,k]
    x_col = jnp.transpose(x4, (0, 3, 2, 1)).reshape(nb, Fdim * V, bn)   # [k*V+i, b] = x[b,i,k]
    # Lane-group replication matrix: P[b, b'*V + j] = (b == b').
    p_mat = jnp.repeat(jnp.eye(bn, dtype=jnp.float32), V, axis=1)       # (bn, bn*V)

    # Only raise the scoped VMEM limit when the estimate needs it; cap well
    # below v7x's 64 MiB physical VMEM.
    vmem_limit = None
    if est > 24 * 1024 * 1024:
        vmem_limit = int(min(est + 8 * 1024 * 1024, 40 * 1024 * 1024))

    cost = pl.CostEstimate(
        flops=int((6 * Fdim + 14) * N * V * V),
        transcendentals=int(N * V * V + N * V),
        bytes_accessed=int(4 * (N * V * V + 2 * N * V * Fdim + nb * 8 * 128)),
    )

    kernel = functools.partial(_graph_learn_kernel, V=V, bn=bn,
                               inv_n=1.0 / N, alpha=float(alpha))

    s_packed, loss_parts = pl.pallas_call(
        kernel,
        out_shape=(
            jax.ShapeDtypeStruct((nb, V, bnV), x.dtype),
            jax.ShapeDtypeStruct((nb, 8, 128), jnp.float32),
        ),
        grid_spec=pltpu.PrefetchScalarGridSpec(
            num_scalar_prefetch=0,
            grid=(nb,),
            in_specs=[
                pl.BlockSpec((1, Fdim, bnV), lambda i: (i, 0, 0)),
                pl.BlockSpec((1, Fdim * V, bn), lambda i: (i, 0, 0)),
                pl.BlockSpec((bn, bnV), lambda i: (0, 0)),
                pl.BlockSpec(memory_space=pltpu.MemorySpace.SMEM),
            ],
            out_specs=[
                pl.BlockSpec((1, V, bnV), lambda i: (i, 0, 0)),
                pl.BlockSpec((1, 8, 128), lambda i: (i, 0, 0)),
            ],
        ),
        compiler_params=pltpu.CompilerParams(
            dimension_semantics=("parallel",),
            vmem_limit_bytes=vmem_limit,
        ),
        cost_estimate=cost,
    )(x_row, x_col, p_mat, a_vec)

    # Unpack S from (nb, V, bn*V) back to (N, V, V).
    S = jnp.transpose(s_packed.reshape(nb, V, bn, V), (0, 2, 1, 3)).reshape(N, V, V)
    ajloss = jnp.sum(loss_parts[:, 0, 0])
    return S, ajloss


def _reference(x, a, alpha):
    """Pure-JAX transcription of the PyTorch forward (exact branch selection)."""
    diff = x[:, :, None, :] - x[:, None, :, :]                  # (N, V, V, F)
    d1 = jnp.einsum('nijk,k->nij', jnp.abs(diff), a[:, 0])
    tmpS = jnp.exp(-jnp.maximum(d1, 0.0))
    S = tmpS / jnp.sum(tmpS, axis=1, keepdims=True)
    # F_norm_loss with 3-D S:
    Sloss = jnp.sum(jnp.mean(S ** 2, axis=0))
    # diff_loss with 3-D S (the module's actual branch):
    #   alpha * sum(matmul(S, sum(diff ** 2, axis=2)))
    Q = jnp.sum(diff ** 2, axis=2)                              # (N, V, F)
    dloss = alpha * jnp.sum(jnp.matmul(S, Q))
    return S, Sloss + dloss


if __name__ == "__main__":
    key = jax.random.PRNGKey(0)
    N, V, F_FEAT = 16, 16, 8         # batch, num_of_vertices, num_of_features
    alpha = 1e-4

    x = jax.random.normal(key, (N, V, F_FEAT), dtype=jnp.float32)
    # nn.init.ones_ on Parameter of shape (num_of_features, 1)
    a = jnp.ones((F_FEAT, 1), dtype=jnp.float32)

    S, ajloss = graph_learn_forward(x, a, alpha)
    jax.block_until_ready((S, ajloss))

    S_ref, loss_ref_val = _reference(x, a, alpha)
    assert jnp.allclose(S, S_ref, rtol=1e-3, atol=1e-3), "S mismatch"
    assert jnp.allclose(ajloss, loss_ref_val, rtol=1e-3, atol=1e-3), "loss mismatch"
    print("KERNEL_OK")
</pallas_src>

<mosaic_0001>
module attributes {stable_mosaic.version = 11 : i64} {
  func.func @_graph_learn_kernel(%arg0: i32, %arg1: memref<1x8x128xf32, #tpu.memory_space<vmem>>, %arg2: memref<1x128x8xf32, #tpu.memory_space<vmem>>, %arg3: memref<8x128xf32, #tpu.memory_space<vmem>>, %arg4: memref<8xf32, #tpu.memory_space<smem>>, %arg5: memref<1x16x128xf32, #tpu.memory_space<vmem>>, %arg6: memref<1x8x128xf32, #tpu.memory_space<vmem>>) attributes {dimension_semantics = [#tpu.dimension_semantics<parallel>], iteration_bounds = array<i64: 2>, scalar_prefetch = 0 : i64, scratch_operands = 0 : i64, tpu.core_type = #tpu.core_type<tc>, window_params = [{transform_indices = @transform_0, window_bounds = array<i64: 1, 8, 128>}, {transform_indices = @transform_1, window_bounds = array<i64: 1, 128, 8>}, {pipeline_mode = #tpu.pipeline_mode<synchronous>, transform_indices = @transform_2, window_bounds = array<i64: 8, 128>}, {transform_indices = @transform_3, window_bounds = array<i64: 8>}, {transform_indices = @transform_4, window_bounds = array<i64: 1, 16, 128>}, {transform_indices = @transform_5, window_bounds = array<i64: 1, 8, 128>}]} {
    %c0 = arith.constant 0 : index
    %c0_0 = arith.constant 0 : index
    %c0_1 = arith.constant 0 : index
    %0 = vector.load %arg1[%c0, %c0_0, %c0_1] : memref<1x8x128xf32, #tpu.memory_space<vmem>>, vector<1x8x128xf32>
    %1 = vector.shape_cast %0 : vector<1x8x128xf32> to vector<8x128xf32>
    %c0_2 = arith.constant 0 : index
    %c0_3 = arith.constant 0 : index
    %c0_4 = arith.constant 0 : index
    %2 = vector.load %arg2[%c0_2, %c0_3, %c0_4] : memref<1x128x8xf32, #tpu.memory_space<vmem>>, vector<1x128x8xf32>
    %3 = vector.shape_cast %2 : vector<1x128x8xf32> to vector<128x8xf32>
    %c0_5 = arith.constant 0 : index
    %c0_6 = arith.constant 0 : index
    %4 = vector.load %arg3[%c0_5, %c0_6] : memref<8x128xf32, #tpu.memory_space<vmem>>, vector<8x128xf32>
    %cst = arith.constant dense<0.000000e+00> : vector<128x128xf32>
    %5 = tpu.matmul %3, %4, %cst {dimension_numbers = #tpu.dot_dimension_numbers<[1], [0], [0], [1], [0, 0, 1, 1], [], []>} : vector<128x8xf32>, vector<8x128xf32>, vector<128x128xf32> -> vector<128x128xf32>
    %cst_7 = arith.constant 0.000000e+00 : f32
    %6 = vector.broadcast %cst_7 : f32 to vector<16x128xf32>
    %cst_8 = arith.constant 0.000000e+00 : f32
    %7 = vector.broadcast %cst_8 : f32 to vector<16x128xf32>
    %8 = vector.extract_strided_slice %5 {offsets = [0, 0], sizes = [16, 128], strides = [1, 1]} : vector<128x128xf32> to vector<16x128xf32>
    %9 = vector.extract_strided_slice %1 {offsets = [0, 0], sizes = [1, 128], strides = [1, 1]} : vector<8x128xf32> to vector<1x128xf32>
    %10 = vector.broadcast %9 : vector<1x128xf32> to vector<16x128xf32>
    %11 = arith.subf %8, %10 : vector<16x128xf32>
    %c0_9 = arith.constant 0 : index
    %12 = memref.load %arg4[%c0_9] : memref<8xf32, #tpu.memory_space<smem>>
    %13 = math.absf %11 : vector<16x128xf32>
    %14 = vector.broadcast %12 : f32 to vector<16x128xf32>
    %15 = arith.mulf %14, %13 : vector<16x128xf32>
    %16 = arith.addf %6, %15 : vector<16x128xf32>
    %17 = arith.mulf %11, %11 : vector<16x128xf32>
    %18 = arith.addf %7, %17 : vector<16x128xf32>
    %19 = vector.extract_strided_slice %5 {offsets = [16, 0], sizes = [16, 128], strides = [1, 1]} : vector<128x128xf32> to vector<16x128xf32>
    %20 = vector.extract_strided_slice %1 {offsets = [1, 0], sizes = [1, 128], strides = [1, 1]} : vector<8x128xf32> to vector<1x128xf32>
    %21 = vector.broadcast %20 : vector<1x128xf32> to vector<16x128xf32>
    %22 = arith.subf %19, %21 : vector<16x128xf32>
    %c1 = arith.constant 1 : index
    %23 = memref.load %arg4[%c1] : memref<8xf32, #tpu.memory_space<smem>>
    %24 = math.absf %22 : vector<16x128xf32>
    %25 = vector.broadcast %23 : f32 to vector<16x128xf32>
    %26 = arith.mulf %25, %24 : vector<16x128xf32>
    %27 = arith.addf %16, %26 : vector<16x128xf32>
    %28 = arith.mulf %22, %22 : vector<16x128xf32>
    %29 = arith.addf %18, %28 : vector<16x128xf32>
    %30 = vector.extract_strided_slice %5 {offsets = [32, 0], sizes = [16, 128], strides = [1, 1]} : vector<128x128xf32> to vector<16x128xf32>
    %31 = vector.extract_strided_slice %1 {offsets = [2, 0], sizes = [1, 128], strides = [1, 1]} : vector<8x128xf32> to vector<1x128xf32>
    %32 = vector.broadcast %31 : vector<1x128xf32> to vector<16x128xf32>
    %33 = arith.subf %30, %32 : vector<16x128xf32>
    %c2 = arith.constant 2 : index
    %34 = memref.load %arg4[%c2] : memref<8xf32, #tpu.memory_space<smem>>
    %35 = math.absf %33 : vector<16x128xf32>
    %36 = vector.broadcast %34 : f32 to vector<16x128xf32>
    %37 = arith.mulf %36, %35 : vector<16x128xf32>
    %38 = arith.addf %27, %37 : vector<16x128xf32>
    %39 = arith.mulf %33, %33 : vector<16x128xf32>
    %40 = arith.addf %29, %39 : vector<16x128xf32>
    %41 = vector.extract_strided_slice %5 {offsets = [48, 0], sizes = [16, 128], strides = [1, 1]} : vector<128x128xf32> to vector<16x128xf32>
    %42 = vector.extract_strided_slice %1 {offsets = [3, 0], sizes = [1, 128], strides = [1, 1]} : vector<8x128xf32> to vector<1x128xf32>
    %43 = vector.broadcast %42 : vector<1x128xf32> to vector<16x128xf32>
    %44 = arith.subf %41, %43 : vector<16x128xf32>
    %c3 = arith.constant 3 : index
    %45 = memref.load %arg4[%c3] : memref<8xf32, #tpu.memory_space<smem>>
    %46 = math.absf %44 : vector<16x128xf32>
    %47 = vector.broadcast %45 : f32 to vector<16x128xf32>
    %48 = arith.mulf %47, %46 : vector<16x128xf32>
    %49 = arith.addf %38, %48 : vector<16x128xf32>
    %50 = arith.mulf %44, %44 : vector<16x128xf32>
    %51 = arith.addf %40, %50 : vector<16x128xf32>
    %52 = vector.extract_strided_slice %5 {offsets = [64, 0], sizes = [16, 128], strides = [1, 1]} : vector<128x128xf32> to vector<16x128xf32>
    %53 = vector.extract_strided_slice %1 {offsets = [4, 0], sizes = [1, 128], strides = [1, 1]} : vector<8x128xf32> to vector<1x128xf32>
    %54 = vector.broadcast %53 : vector<1x128xf32> to vector<16x128xf32>
    %55 = arith.subf %52, %54 : vector<16x128xf32>
    %c4 = arith.constant 4 : index
    %56 = memref.load %arg4[%c4] : memref<8xf32, #tpu.memory_space<smem>>
    %57 = math.absf %55 : vector<16x128xf32>
    %58 = vector.broadcast %56 : f32 to vector<16x128xf32>
    %59 = arith.mulf %58, %57 : vector<16x128xf32>
    %60 = arith.addf %49, %59 : vector<16x128xf32>
    %61 = arith.mulf %55, %55 : vector<16x128xf32>
    %62 = arith.addf %51, %61 : vector<16x128xf32>
    %63 = vector.extract_strided_slice %5 {offsets = [80, 0], sizes = [16, 128], strides = [1, 1]} : vector<128x128xf32> to vector<16x128xf32>
    %64 = vector.extract_strided_slice %1 {offsets = [5, 0], sizes = [1, 128], strides = [1, 1]} : vector<8x128xf32> to vector<1x128xf32>
    %65 = vector.broadcast %64 : vector<1x128xf32> to vector<16x128xf32>
    %66 = arith.subf %63, %65 : vector<16x128xf32>
    %c5 = arith.constant 5 : index
    %67 = memref.load %arg4[%c5] : memref<8xf32, #tpu.memory_space<smem>>
    %68 = math.absf %66 : vector<16x128xf32>
    %69 = vector.broadcast %67 : f32 to vector<16x128xf32>
    %70 = arith.mulf %69, %68 : vector<16x128xf32>
    %71 = arith.addf %60, %70 : vector<16x128xf32>
    %72 = arith.mulf %66, %66 : vector<16x128xf32>
    %73 = arith.addf %62, %72 : vector<16x128xf32>
    %74 = vector.extract_strided_slice %5 {offsets = [96, 0], sizes = [16, 128], strides = [1, 1]} : vector<128x128xf32> to vector<16x128xf32>
    %75 = vector.extract_strided_slice %1 {offsets = [6, 0], sizes = [1, 128], strides = [1, 1]} : vector<8x128xf32> to vector<1x128xf32>
    %76 = vector.broadcast %75 : vector<1x128xf32> to vector<16x128xf32>
    %77 = arith.subf %74, %76 : vector<16x128xf32>
    %c6 = arith.constant 6 : index
    %78 = memref.load %arg4[%c6] : memref<8xf32, #tpu.memory_space<smem>>
    %79 = math.absf %77 : vector<16x128xf32>
    %80 = vector.broadcast %78 : f32 to vector<16x128xf32>
    %81 = arith.mulf %80, %79 : vector<16x128xf32>
    %82 = arith.addf %71, %81 : vector<16x128xf32>
    %83 = arith.mulf %77, %77 : vector<16x128xf32>
    %84 = arith.addf %73, %83 : vector<16x128xf32>
    %85 = vector.extract_strided_slice %5 {offsets = [112, 0], sizes = [16, 128], strides = [1, 1]} : vector<128x128xf32> to vector<16x128xf32>
    %86 = vector.extract_strided_slice %1 {offsets = [7, 0], sizes = [1, 128], strides = [1, 1]} : vector<8x128xf32> to vector<1x128xf32>
    %87 = vector.broadcast %86 : vector<1x128xf32> to vector<16x128xf32>
    %88 = arith.subf %85, %87 : vector<16x128xf32>
    %c7 = arith.constant 7 : index
    %89 = memref.load %arg4[%c7] : memref<8xf32, #tpu.memory_space<smem>>
    %90 = math.absf %88 : vector<16x128xf32>
    %91 = vector.broadcast %89 : f32 to vector<16x128xf32>
    %92 = arith.mulf %91, %90 : vector<16x128xf32>
    %93 = arith.addf %82, %92 : vector<16x128xf32>
    %94 = arith.mulf %88, %88 : vector<16x128xf32>
    %95 = arith.addf %84, %94 : vector<16x128xf32>
    %cst_10 = arith.constant 0.000000e+00 : f32
    %96 = vector.broadcast %cst_10 : f32 to vector<16x128xf32>
    %97 = arith.maximumf %93, %96 : vector<16x128xf32>
    %cst_11 = arith.constant 0.000000e+00 : f32
    %98 = vector.broadcast %cst_11 : f32 to vector<16x128xf32>
    %99 = arith.subf %98, %97 : vector<16x128xf32>
    %100 = math.exp %99 : vector<16x128xf32>
    %cst_12 = arith.constant dense<0.000000e+00> : vector<128xf32>
    %101 = vector.multi_reduction <add>, %100, %cst_12 [0] : vector<16x128xf32> to vector<128xf32>
    %102 = vector.shape_cast %101 : vector<128xf32> to vector<1x128xf32>
    %103 = tpu.reciprocal %102 {approx = true} : vector<1x128xf32> -> vector<1x128xf32>
    %104 = arith.mulf %102, %103 : vector<1x128xf32>
    %cst_13 = arith.constant 2.000000e+00 : f32
    %105 = vector.broadcast %cst_13 : f32 to vector<1x128xf32>
    %106 = arith.subf %105, %104 : vector<1x128xf32>
    %107 = arith.mulf %103, %106 : vector<1x128xf32>
    %108 = vector.broadcast %107 : vector<1x128xf32> to vector<16x128xf32>
    %109 = arith.mulf %100, %108 : vector<16x128xf32>
    %110 = vector.shape_cast %109 : vector<16x128xf32> to vector<1x16x128xf32>
    %c0_14 = arith.constant 0 : index
    %c0_15 = arith.constant 0 : index
    %c0_16 = arith.constant 0 : index
    %111 = vector.load %arg5[%c0_14, %c0_15, %c0_16] : memref<1x16x128xf32, #tpu.memory_space<vmem>>, vector<1x16x128xf32>
    tpu.vector_store %arg5[%c0_14, %c0_15, %c0_16], %110 {strides = array<i32>} : memref<1x16x128xf32, #tpu.memory_space<vmem>>, vector<1x16x128xf32>,
    %112 = arith.mulf %109, %109 : vector<16x128xf32>
    %cst_17 = arith.constant dense<0.000000e+00> : vector<16xf32>
    %113 = vector.multi_reduction <add>, %112, %cst_17 [1] : vector<16x128xf32> to vector<16xf32>
    %114 = vector.shape_cast %113 : vector<16xf32> to vector<16x1xf32>
    %cst_18 = arith.constant dense<0.000000e+00> : vector<1xf32>
    %115 = vector.multi_reduction <add>, %114, %cst_18 [0] : vector<16x1xf32> to vector<1xf32>
    %116 = vector.shape_cast %115 : vector<1xf32> to vector<1x1xf32>
    %cst_19 = arith.constant dense<0.000000e+00> : vector<128xf32>
    %117 = vector.multi_reduction <add>, %95, %cst_19 [0] : vector<16x128xf32> to vector<128xf32>
    %118 = vector.shape_cast %117 : vector<128xf32> to vector<1x128xf32>
    %cst_20 = arith.constant dense<0.000000e+00> : vector<128xf32>
    %119 = vector.multi_reduction <add>, %109, %cst_20 [0] : vector<16x128xf32> to vector<128xf32>
    %120 = vector.shape_cast %119 : vector<128xf32> to vector<1x128xf32>
    %121 = arith.mulf %118, %120 : vector<1x128xf32>
    %cst_21 = arith.constant dense<0.000000e+00> : vector<1xf32>
    %122 = vector.multi_reduction <add>, %121, %cst_21 [1] : vector<1x128xf32> to vector<1xf32>
    %123 = vector.shape_cast %122 : vector<1xf32> to vector<1x1xf32>
    %cst_22 = arith.constant 6.250000e-02 : f32
    %124 = vector.broadcast %cst_22 : f32 to vector<1x1xf32>
    %125 = arith.mulf %116, %124 : vector<1x1xf32>
    %cst_23 = arith.constant 9.99999974E-5 : f32
    %126 = vector.broadcast %cst_23 : f32 to vector<1x1xf32>
    %127 = arith.mulf %126, %123 : vector<1x1xf32>
    %128 = arith.addf %125, %127 : vector<1x1xf32>
    %129 = vector.shape_cast %128 : vector<1x1xf32> to vector<1x1x1xf32>
    %130 = vector.broadcast %129 : vector<1x1x1xf32> to vector<1x8x128xf32>
    %c0_24 = arith.constant 0 : index
    %c0_25 = arith.constant 0 : index
    %c0_26 = arith.constant 0 : index
    %131 = vector.load %arg6[%c0_24, %c0_25, %c0_26] : memref<1x8x128xf32, #tpu.memory_space<vmem>>, vector<1x8x128xf32>
    tpu.vector_store %arg6[%c0_24, %c0_25, %c0_26], %130 {strides = array<i32>} : memref<1x8x128xf32, #tpu.memory_space<vmem>>, vector<1x8x128xf32>,
    return
  }
  func.func @transform_0(%arg0: i32) -> (i32, i32, i32) {
    %c0_i32 = arith.constant 0 : i32
    %c0_i32_0 = arith.constant 0 : i32
    %c0_i32_1 = arith.constant 0 : i32
    return %arg0, %c0_i32, %c0_i32_0 : i32, i32, i32
  }
  func.func @transform_1(%arg0: i32) -> (i32, i32, i32) {
    %c0_i32 = arith.constant 0 : i32
    %c0_i32_0 = arith.constant 0 : i32
    %c0_i32_1 = arith.constant 0 : i32
    return %arg0, %c0_i32, %c0_i32_0 : i32, i32, i32
  }
  func.func @transform_2(%arg0: i32) -> (i32, i32) {
    %c0_i32 = arith.constant 0 : i32
    %c0_i32_0 = arith.constant 0 : i32
    %c0_i32_1 = arith.constant 0 : i32
    return %c0_i32, %c0_i32_0 : i32, i32
  }
  func.func @transform_3(%arg0: i32) -> i32 {
    %c0_i32 = arith.constant 0 : i32
    %c0_i32_0 = arith.constant 0 : i32
    return %c0_i32 : i32
  }
  func.func @transform_4(%arg0: i32) -> (i32, i32, i32) {
    %c0_i32 = arith.constant 0 : i32
    %c0_i32_0 = arith.constant 0 : i32
    %c0_i32_1 = arith.constant 0 : i32
    return %arg0, %c0_i32, %c0_i32_0 : i32, i32, i32
  }
  func.func @transform_5(%arg0: i32) -> (i32, i32, i32) {
    %c0_i32 = arith.constant 0 : i32
    %c0_i32_0 = arith.constant 0 : i32
    %c0_i32_1 = arith.constant 0 : i32
    return %arg0, %c0_i32, %c0_i32_0 : i32, i32, i32
  }
}

</mosaic_0001>

<bundles_post_ra>
// kernel: tpu_custom_call.1
= control target key start
LH: loop header
LB: loop body
LE: loop exit
PB: predicated region body
PF: predicated region fallthrough
CT: control target
= control target key end

     0   :  { %11 = vsyncpa [#allocation4], 0  ;;  %s1391_s0 = inlined_call_operand.vmem [shape: f32[2,8,128], index: 0, kind: input, shape index: {}]   ;;  %s1392_s1 = inlined_call_operand.vmem [shape: f32[2,128,8], index: 1, kind: input, shape index: {}]   ;;  %s1393_s2 = inlined_call_operand.vmem [shape: f32[8,128], index: 2, kind: input, shape index: {}]   ;;  %s1394_s3 = inlined_call_operand.vmem [shape: f32[8], index: 3, kind: input, shape index: {}]   ;;  %s1395_s4 = inlined_call_operand.hbm [shape: f32[2,16,128], index: 4, kind: output, shape index: {0}]   ;;  %s1396_s5 = inlined_call_operand.hbm [shape: f32[2,8,128], index: 5, kind: output, shape index: {1}]  }
   0x1   :  { %12 = vsyncpa [#allocation3], 0 }
   0x2   :  { %14 = vsyncpa [#allocation3 + $0x1], 0 }
   0x3   :  { %15 = vsyncpa [#allocation7], 0 }
   0x4   :  { %17 = vsyncpa [#allocation7 + $0x1], 0  ;;  %s1125_s18 = smov 0   ;;  %s1127_s19 = smov 0  }
   0x5   :  { %s1129_s20 = smov 0   ;;  %s1131_s21 = smov 0  }
   0x6 LB: > { %s1146_s22 = sadd.s32 4294967295, %s1088_s21   ;;  %s828_s23 = sadd.s32 4294967294, %s1088_s21   ;;  %s1088_s21 = sphi %s1131_s21, %s1403_s21   ;;  %s1084_s20 = sphi %s1129_s20, %s1402_s20   ;;  %s1080_s19 = sphi %s1127_s19, %s1401_s19   ;;  %s1076_s18 = sphi %s1125_s18, %s1400_s18  }
   0x7   : > { %s1150_s24 = sadd.s32 1, %s1088_s21   ;;  %s124_s25 = sadd.s32 1, %s1084_s20 }
   0x8   : > { %s121_s26 = ssub.s32 %s1088_s21, %s1150_s24  ;;  %p134_p0 = scmp.ne.s32.totalorder %s1084_s20, %s1080_s19 }
   0x9   : > { %p122_p1 = scmp.eq.s32.totalorder %s121_s26, 0  ;;  %p135_p2 = scmp.eq.s32.totalorder %s1146_s22, 1 }
   0xa   : > { %p140_p3 = scmp.ne.s32.totalorder %s1080_s19, %s1076_s18  ;;  %p141_p4 = scmp.eq.s32.totalorder %s828_s23, 1 }
   0xb   : > { %s1161_s27 = scalar_select %p122_p1, %s1084_s20, %s124_s25  }
   0xc   : > { %p1163_p5 = por %p135_p2, %p134_p0  ;;  %p1167_p6 = por %p141_p4, %p140_p3 }
   0xd   : > { %p829_p7 = scmp.ge.s32.totalorder %s1088_s21, 1  ;;  %p174_p8 = scmp.lt.s32.totalorder %s1088_s21, 3 }
   0xe   : > { %p935_p9 = scmp.eq.s32.totalorder %s1146_s22, 0  ;;  %s190_s8 = sshll.u32 %s1394_s3, 4  ;;  %s191_s8 = int_to_ptr.vmem [resolvable:$true] %s190_s8 }
   0xf   : > { %p1174_p10 = pnand %p829_p7, %p174_p8  ;;  %s979_s9 = scalar_lea.vmem %s191_s8, 16 }
  0x10   : > { %p980_p13 = scmp.ne.s32.totalorder %s191_s8, %s979_s9  ;;  %p987_p3 = scmp.lt.s32.totalorder %s191_s8, %s191_s8 }
  0x11   : > { %p924_p11 = pneg %p1174_p10  ;;  %p988_p4 = scmp.lt.s32.totalorder %s979_s9, %s979_s9 }
  0x13   : > { %p925_p12 = pnand %p935_p9, %p924_p11  ;;  %p989_p7 = por %p988_p4, %p987_p3 }
  0x15   : > { %p981_p0 = pneg %p925_p12 }
  0x17   : > { %p982_p1 = pnand %p981_p0, %p980_p13 }
  0x19   : > { %p983_p2 = pneg %p982_p1 }
  0x1b   : > { %p990_p8 = pnand %p989_p7, %p983_p2 }
  0x1d   : > { %993 = shalt.err (!%p990_p8)
}
  0x1e   : > { %s1090_s10 = smov [#allocation2]   ;;  %218 = sbr.rel (%p1174_p10) target bundleno = 500 (0x1f4), region = 36 }
  0x1f   : > { %927 = dma.vmem_to_smem (!%p925_p12), %s191_s8, 16, %s1090_s10, [#allocation4]  }
  0x23   : > { %1063 = dma.done.wait (%p935_p9), [#allocation4], 16  }
  0x24   : > { %1065 = vsyncadd (%p935_p9), [#allocation4], 4294967280 }
  0x25   : > { %224 = sfence }
  0x26   : > { %v282_v0 = vld [vmem:[%s1393_s2] sm:$0xff]  ;;  %p256_p11 = scmp.lt.s32.totalorder %s1146_s22, 1  ;;  %vm283_vm0 = vcmask 64512   ;;  %v477_v17 = vlaneseq  ;;  %s1222_s6 = sld [smem:[#allocation2]] }
  0x27   : > { %888 = vmatprep.subr.mxu0 %v282_v0  ;;  %914 = vmatprep.subr.mxu1 %v282_v0  ;;  %s1224_s7 = sld [smem:[#allocation2 + $0x1]] }
  0x28   : > { %889 = vmatpush3.msra.mxu0 %v282_v0  ;;  %s1196_s13 = scalar_select %p256_p11, %s1146_s22, 1  ;;  %915 = vmatpush3.msra.mxu1 %v282_v0  ;;  %v478_v18 = vshrl.u32 %v477_v17, 7 }
  0x29   : > { %s1226_s8 = sld [smem:[#allocation2 + $0x4]] }
  0x2a   : > { %s869_s14 = sshll.u32 %s1196_s13, 7  ;;  %s836_s23 = sshll.u32 %s1196_s13, 3  ;;  %v479_v19 = vsub.s32 0, %v478_v18  ;;  %v497_v20 = vsub.s32 1, %v478_v18  ;;  %v515_v27 = vsub.s32 2, %v478_v18  ;;  %v551_v28 = vsub.s32 4, %v478_v18 }
  0x2b   : > { %s264_s17 = scalar_lea.vmem %s1392_s1, %s869_s14  ;;  %s259_s30 = scalar_lea.vmem %s1391_s0, %s836_s23  ;;  %v569_v34 = vsub.s32 5, %v478_v18  ;;  %v533_v35 = vsub.s32 3, %v478_v18  ;;  %v587_v38 = vsub.s32 6, %v478_v18  ;;  %v605_v48 = vsub.s32 7, %v478_v18 }
  0x2c   : > { %v266_v1 = vld [vmem:[%s264_s17] sm:$0xff]  ;;  %v267_v2 = vld [vmem:[%s264_s17 + $0x8] sm:$0xff]  ;;  %v268_v3 = vld [vmem:[%s264_s17 + $0x10] sm:$0xff]  ;;  %s1228_s9 = sld [smem:[#allocation2 + $0x2]]  ;;  %v486_v39 = vstv %s1222_s6  ;;  %s1322_s14 = sand.u32 1, %s1080_s19  }
  0x2d   : > { %890 = vmatprep.mubr.msk.f32.mxu0 %vm283_vm0, %v266_v1  ;;  %v274_v4 = vld [vmem:[%s264_s17 + $0x40] sm:$0xff]  ;;  %v275_v5 = vld [vmem:[%s264_s17 + $0x48] sm:$0xff]  ;;  %v276_v6 = vld [vmem:[%s264_s17 + $0x50] sm:$0xff]  ;;  %s1230_s10 = sld [smem:[#allocation2 + $0x5]]  ;;  %v504_v45 = vstv %s1224_s7  ;;  %s834_s15 = sshll.u32 %s1322_s14, 4 }
  0x2e   : > { %891 = vmatmul.mubr.msk.f32.vlgmr.msra.gmra.mxu0 %vm283_vm0, %v267_v2  ;;  %902 = vmatprep.mubr.msk.f32.mxu1 %vm283_vm0, %v274_v4  ;;  %v269_v7 = vld [vmem:[%s264_s17 + $0x18] sm:$0xff]  ;;  %v270_v8 = vld [vmem:[%s264_s17 + $0x20] sm:$0xff]  ;;  %v271_v11 = vld [vmem:[%s264_s17 + $0x28] sm:$0xff]  ;;  %s1232_s11 = sld [smem:[#allocation2 + $0x3]]  ;;  %s248_s16 = scalar_lea.vmem [#allocation5], %s834_s15 }
  0x2f   : > { %893 = vmatprep.mubr.msk.f32.mxu0 %vm283_vm0, %v268_v3  ;;  %903 = vmatmul.mubr.msk.f32.vlgmr.msra.gmra.mxu1 %vm283_vm0, %v275_v5  ;;  %v277_v9 = vld [vmem:[%s264_s17 + $0x58] sm:$0xff]  ;;  %v278_v10 = vld [vmem:[%s264_s17 + $0x60] sm:$0xff]  ;;  %v272_v12 = vld [vmem:[%s264_s17 + $0x30] sm:$0xff]  ;;  %s1234_s12 = sld [smem:[#allocation2 + $0x6]]  ;;  %v558_v46 = vstv %s1226_s8  ;;  %s679_s6 = scalar_lea.sflag [#allocation3], %s1322_s14 }
  0x30   : > { %905 = vmatprep.mubr.msk.f32.mxu1 %vm283_vm0, %v276_v6  ;;  %v279_v13 = vld [vmem:[%s264_s17 + $0x68] sm:$0xff]  ;;  %v280_v14 = vld [vmem:[%s264_s17 + $0x70] sm:$0xff]  ;;  %v273_v15 = vld [vmem:[%s264_s17 + $0x38] sm:$0xff]  ;;  %s1240_s13 = sld [smem:[#allocation2 + $0x7]]  ;;  %s1091_s8 = smov [#allocation5]  }
  0x31   : > { %v281_v16 = vld [vmem:[%s264_s17 + $0x78] sm:$0xff]  ;;  %v265_v21 = vld [vmem:[%s259_s30] sm:$0xff]  ;;  %s870_s17 = sshll.u32 %s1146_s22, 8  ;;  %s697_s30 = sshll.u32 %s248_s16, 4  ;;  %s1331_s30 = int_to_ptr.vmem [resolvable:$true] %s697_s30 }
  0x32   : > { %894 = vmatmul.mubr.msk.f32.gmra.mxu0 %vm283_vm0, %v269_v7  ;;  %v480_v23 = vrot.slane %v265_v21, %v479_v19  ;;  %v498_v24 = vrot.slane %v265_v21, %v497_v20  ;;  %v516_v37 = vrot.slane %v265_v21, %v515_v27  ;;  %v552_v42 = vrot.slane %v265_v21, %v551_v28  ;;  %s1329_s26 = scalar_lea.hbm %s1395_s4, %s870_s17  ;;  %s994_s7 = scalar_lea.vmem %s1331_s30, 256 }
  0x33   : > { %896 = vmatprep.mubr.msk.f32.mxu0 %vm283_vm0, %v270_v8  ;;  %906 = vmatmul.mubr.msk.f32.gmra.mxu1 %vm283_vm0, %v277_v9  ;;  %v522_v50 = vstv %s1228_s9  ;;  %v570_v51 = vrot.slane %v265_v21, %v569_v34  ;;  %v534_v52 = vrot.slane %v265_v21, %v533_v35  ;;  %v576_v57 = vstv %s1230_s10  ;;  %p995_p9 = scmp.ne.s32.totalorder %s1331_s30, %s994_s7  ;;  %s998_s9 = sshll.u32 %s1091_s8, 4  ;;  %s999_s9 = int_to_ptr.vmem [resolvable:$false] %s998_s9 }
  0x34   : > { %908 = vmatprep.mubr.msk.f32.mxu1 %vm283_vm0, %v278_v10  ;;  %v588_v58 = vrot.slane %v265_v21, %v587_v38  ;;  %v540_v62 = vstv %s1232_s11  ;;  %v606_v4 = vrot.slane %v265_v21, %v605_v48  ;;  %s1000_s10 = scalar_lea.vmem %s999_s9, 512  ;;  %p1001_p13 = scmp.lt.s32.totalorder %s1331_s30, %s999_s9 }
  0x35   : > { %v594_v3 = vstv %s1234_s12  ;;  %p996_p10 = pnand %p995_p9, %p1163_p5  ;;  %p1002_p0 = scmp.lt.s32.totalorder %s1000_s10, %s994_s7 }
  0x36   : > { %897 = vmatmul.mubr.msk.f32.gmra.mxu0 %vm283_vm0, %v271_v11 }
  0x37   : > { %899 = vmatprep.mubr.msk.f32.mxu0 %vm283_vm0, %v272_v12  ;;  %909 = vmatmul.mubr.msk.f32.gmra.mxu1 %vm283_vm0, %v279_v13  ;;  %p997_p12 = pneg %p996_p10  ;;  %p1003_p1 = por %p1002_p0, %p1001_p13 }
  0x38   : > { %911 = vmatprep.mubr.msk.f32.mxu1 %vm283_vm0, %v280_v14  ;;  %v612_v14 = vstv %s1240_s13 }
  0x39   : > { %p1004_p2 = pnand %p1003_p1, %p997_p12 }
  0x3a   : > { %900 = vmatmul.mubr.msk.f32.gmra.mxu0 %vm283_vm0, %v273_v15 }
  0x3b   : > { %912 = vmatmul.mubr.msk.f32.gmra.mxu1 %vm283_vm0, %v281_v16 }
  0xee   : > { %v892_v22 = vpop.f32.mrf.mxu0 }
  0xef   : > { %v904_v25 = vpop.f32.mrf.mxu1  ;;  %v1236_v31 = vsub.f32 %v892_v22, %v480_v23 }
  0xf0   : > { %v398_v26 = vpop.f32.mrf.mxu0  ;;  %v1256_v60 = vsub.f32 %v904_v25, %v552_v42 }
  0xf1   : > { %v438_v29 = vpop.f32.mrf.mxu1  ;;  %v1246_v44 = vsub.f32 %v398_v26, %v480_v23  ;;  %v485_v49 = vand.u32 2147483647, %v1236_v31 }
  0xf2   : > { %v895_v30 = vpop.f32.mrf.mxu0  ;;  %v1269_v12 = vsub.f32 %v438_v29, %v552_v42  ;;  %v557_v16 = vand.u32 2147483647, %v1256_v60 }
  0xf3   : > { %v1238_v32 = vsub.f32 %v895_v30, %v498_v24  ;;  %v907_v33 = vpop.f32.mrf.mxu1  ;;  %v484_v0 = vand.u32 2147483647, %v1246_v44  ;;  %v488_v5 = vmul.f32 %v486_v39, %v485_v49 }
  0xf4   : > { %v408_v36 = vpop.f32.mrf.mxu0  ;;  %v1265_v7 = vsub.f32 %v907_v33, %v570_v51  ;;  %v556_v29 = vand.u32 2147483647, %v1269_v12  ;;  %v560_v34 = vmul.f32 %v558_v46, %v557_v16  ;;  %v492_v16 = vmul.f32 %v1236_v31, %v1236_v31 }
  0xf5   : > { %v503_v40 = vand.u32 2147483647, %v1238_v32  ;;  %v1244_v41 = vsub.f32 %v408_v36, %v498_v24  ;;  %v448_v43 = vpop.f32.mrf.mxu1  ;;  %v487_v19 = vmul.f32 %v486_v39, %v484_v0 }
  0xf6   : > { %v898_v47 = vpop.f32.mrf.mxu0  ;;  %v1276_v21 = vsub.f32 %v448_v43, %v570_v51  ;;  %v575_v24 = vand.u32 2147483647, %v1265_v7 }
  0xf7   : > { %v910_v53 = vpop.f32.mrf.mxu1  ;;  %v502_v54 = vand.u32 2147483647, %v1244_v41  ;;  %v1253_v55 = vsub.f32 %v898_v47, %v516_v37  ;;  %v506_v59 = vmul.f32 %v504_v45, %v503_v40  ;;  %v559_v47 = vmul.f32 %v558_v46, %v556_v29 }
  0xf8   : > { %v418_v56 = vpop.f32.mrf.mxu0  ;;  %v1274_v18 = vsub.f32 %v910_v53, %v588_v58  ;;  %v574_v39 = vand.u32 2147483647, %v1276_v21  ;;  %v578_v43 = vmul.f32 %v576_v57, %v575_v24 }
  0xf9   : > { %v1258_v61 = vsub.f32 %v418_v56, %v516_v37  ;;  %v458_v63 = vpop.f32.mrf.mxu1  ;;  %v521_v1 = vand.u32 2147483647, %v1253_v55  ;;  %v505_v10 = vmul.f32 %v504_v45, %v502_v54  ;;  %v508_v15 = vadd.f32 %v506_v59, %v488_v5 }
  0xfa   : > { %v901_v2 = vpop.f32.mrf.mxu0  ;;  %v1282_v33 = vsub.f32 %v458_v63, %v588_v58  ;;  %v593_v36 = vand.u32 2147483647, %v1274_v18  ;;  %v577_v53 = vmul.f32 %v576_v57, %v574_v39  ;;  %v509_v57 = vmul.f32 %v1244_v41, %v1244_v41 }
  0xfb   : > { %v520_v6 = vand.u32 2147483647, %v1258_v61  ;;  %v1267_v8 = vsub.f32 %v901_v2, %v534_v52  ;;  %v913_v9 = vpop.f32.mrf.mxu1  ;;  %v524_v11 = vmul.f32 %v522_v50, %v521_v1  ;;  %v507_v28 = vadd.f32 %v505_v10, %v487_v19 }
  0xfc   : > { %v428_v13 = vpop.f32.mrf.mxu0  ;;  %v1279_v26 = vsub.f32 %v913_v9, %v606_v4  ;;  %v592_v49 = vand.u32 2147483647, %v1282_v33  ;;  %v596_v51 = vmul.f32 %v594_v3, %v593_v36  ;;  %v528_v19 = vmul.f32 %v1253_v55, %v1253_v55 }
  0xfd   : > { %v539_v17 = vand.u32 2147483647, %v1267_v8  ;;  %v523_v20 = vmul.f32 %v522_v50, %v520_v6  ;;  %v535_v22 = vsub.f32 %v428_v13, %v534_v52  ;;  %v526_v23 = vadd.f32 %v524_v11, %v508_v15  ;;  %v468_v27 = vpop.f32.mrf.mxu1 }
  0xfe   : > { %v611_v37 = vand.u32 2147483647, %v1279_v26  ;;  %v1287_v42 = vsub.f32 %v468_v27, %v606_v4  ;;  %v595_v63 = vmul.f32 %v594_v3, %v592_v49  ;;  %v491_v13 = vmul.f32 %v1246_v44, %v1246_v44 }
  0xff   : > { %v542_v25 = vmul.f32 %v540_v62, %v539_v17  ;;  %v538_v30 = vand.u32 2147483647, %v535_v22  ;;  %v525_v38 = vadd.f32 %v523_v20, %v507_v28  ;;  %v510_v3 = vmul.f32 %v1238_v32, %v1238_v32 }
 0x100   : > { %v614_v52 = vmul.f32 %v612_v14, %v611_v37  ;;  %v610_v56 = vand.u32 2147483647, %v1287_v42  ;;  %v511_v17 = vadd.f32 %v509_v57, %v491_v13  ;;  %v545_v20 = vmul.f32 %v535_v22, %v535_v22 }
 0x101   : > { %v544_v35 = vadd.f32 %v542_v25, %v526_v23  ;;  %v541_v40 = vmul.f32 %v540_v62, %v538_v30  ;;  %v512_v23 = vadd.f32 %v510_v3, %v492_v16  ;;  %v546_v44 = vmul.f32 %v1267_v8, %v1267_v8 }
 0x102   : > { %v613_v1 = vmul.f32 %v612_v14, %v610_v56  ;;  %v527_v14 = vmul.f32 %v1258_v61, %v1258_v61  ;;  %v563_v61 = vmul.f32 %v1269_v12, %v1269_v12  ;;  %v564_v30 = vmul.f32 %v1256_v60, %v1256_v60 }
 0x103   : > { %v562_v45 = vadd.f32 %v560_v34, %v544_v35  ;;  %v543_v48 = vadd.f32 %v541_v40, %v525_v38  ;;  %v530_v32 = vadd.f32 %v528_v19, %v512_v23  ;;  %v581_v35 = vmul.f32 %v1276_v21, %v1276_v21 }
 0x104   : > { %v529_v24 = vadd.f32 %v527_v14, %v511_v17  ;;  %v582_v8 = vmul.f32 %v1265_v7, %v1265_v7  ;;  %v599_v12 = vmul.f32 %v1282_v33, %v1282_v33  ;;  %v600_v60 = vmul.f32 %v1274_v18, %v1274_v18 }
 0x105   : > { %v580_v50 = vadd.f32 %v578_v43, %v562_v45  ;;  %v561_v54 = vadd.f32 %v559_v47, %v543_v48  ;;  %v548_v29 = vadd.f32 %v546_v44, %v530_v32  ;;  %v618_v21 = vmul.f32 %v1279_v26, %v1279_v26 }
 0x106   : > { %v547_v27 = vadd.f32 %v545_v20, %v529_v24  ;;  %v617_v45 = vmul.f32 %v1287_v42, %v1287_v42 }
 0x107   : > { %v598_v58 = vadd.f32 %v596_v51, %v580_v50  ;;  %v579_v59 = vadd.f32 %v577_v53, %v561_v54  ;;  %v566_v34 = vadd.f32 %v564_v30, %v548_v29 }
 0x108   : > { %v565_v55 = vadd.f32 %v563_v61, %v547_v27 }
 0x109   : > { %v616_v0 = vadd.f32 %v614_v52, %v598_v58  ;;  %v597_v62 = vadd.f32 %v595_v63, %v579_v59  ;;  %v584_v39 = vadd.f32 %v582_v8, %v566_v34 }
 0x10a   : > { %v583_v37 = vadd.f32 %v581_v35, %v565_v55 }
 0x10b   : > { %v622_v2 = vmax.f32 %v616_v0, 0.0  ;;  %v615_v4 = vadd.f32 %v613_v1, %v597_v62  ;;  %v602_v43 = vadd.f32 %v600_v60, %v584_v39 }
 0x10c   : > { %v601_v40 = vadd.f32 %v599_v12, %v583_v37 }
 0x10d   : > { %v624_v5 = vsub.f32 0.0, %v622_v2  ;;  %v621_v46 = vmax.f32 %v615_v4, 0.0  ;;  %v620_v7 = vadd.f32 %v618_v21, %v602_v43 }
 0x10e   : > { %v619_v47 = vadd.f32 %v617_v45, %v601_v40 }
 0x10f   : > { %v627_v6 = vmul.f32 1.442695, %v624_v5  ;;  %v623_v9 = vsub.f32 0.0, %v621_v46 }
 0x110   : > { %v657_v48 = vadd.f32 %v620_v7, %v619_v47 }
 0x111   : > { %v625_v10 = vmul.f32 1.442695, %v623_v9  ;;  %973 = vpow2.f32 %v627_v6 }
 0x112   : > { %v658_v50 = vrot.slane %v657_v48, 4 }
 0x113   : > { %975 = vpow2.f32 %v625_v10 }
 0x114   : > { %v659_v52 = vadd.f32 %v658_v50, %v657_v48 }
 0x116   : > { %v660_v26 = vrot.slane %v659_v52, 2 }
 0x118   : > { %v661_v63 = vadd.f32 %v660_v26, %v659_v52 }
 0x11a   : > { %v662_v1 = vrot.slane %v661_v63, 1 }
 0x11c   : > { %v663_v5 = vadd.f32 %v662_v1, %v661_v63 }
 0x11e   : > { %v974_v11 = vpop.eup %973 }
 0x120   : > { %v976_v15 = vpop.eup %975 }
 0x121   : > { %v629_v41 = vadd.f32 %v976_v15, %v974_v11 }
 0x123   : > { %v630_v25 = vrot.slane %v629_v41, 4 }
 0x125   : > { %v631_v28 = vadd.f32 %v630_v25, %v629_v41 }
 0x127   : > { %v632_v31 = vrot.slane %v631_v28, 2 }
 0x129   : > { %v633_v22 = vadd.f32 %v632_v31, %v631_v28 }
 0x12b   : > { %v634_v36 = vrot.slane %v633_v22, 1 }
 0x12d   : > { %v635_v38 = vadd.f32 %v634_v36, %v633_v22 }
 0x12f   : > { %977 = vrcp.f32 %v635_v38 }
 0x13c   : > { %v978_v49 = vpop.eup %977 }
 0x13d   : > { %v637_v33 = vmul.f32 %v978_v49, %v635_v38 }
 0x13f   : > { %v638_v51 = vsub.f32 2.0, %v637_v33 }
 0x141   : > { %v639_v18 = vmul.f32 %v978_v49, %v638_v51 }
 0x143   : > { %v640_v53 = vmul.f32 %v976_v15, %v639_v18  ;;  %v641_v54 = vmul.f32 %v974_v11, %v639_v18 }
 0x145   : > { %v644_v56 = vmul.f32 %v640_v53, %v640_v53  ;;  %642 = vst [vmem:[%s248_s16] sm:$0xff] %v640_v53  ;;  %643 = vst [vmem:[%s248_s16 + $0x8] sm:$0xff] %v641_v54  ;;  %v664_v42 = vadd.f32 %v641_v54, %v640_v53  ;;  %v645_v59 = vmul.f32 %v641_v54, %v641_v54 }
 0x147   : > { %646 = vadd.xlane.f32.xlu0 %v644_v56  ;;  %v665_v58 = vrot.slane %v664_v42, 4 }
 0x149   : > { %v666_v0 = vadd.f32 %v665_v58, %v664_v42 }
 0x14b   : > { %648 = vadd.xlane.f32.xlu0 %v645_v59  ;;  %v667_v62 = vrot.slane %v666_v0, 2 }
 0x14d   : > { %v668_v2 = vadd.f32 %v667_v62, %v666_v0 }
 0x14f   : > { %v669_v4 = vrot.slane %v668_v2, 1 }
 0x151   : > { %v670_v46 = vadd.f32 %v669_v4, %v668_v2 }
 0x153   : > { %v671_v6 = vmul.f32 %v670_v46, %v663_v5 }
 0x155   : > { %672 = vadd.xlane.f32.xlu1 %v671_v6 }
 0x156   : > { %1007 = shalt.err (!%p1004_p2)
}
 0x157   : > { %s1008_s11 = scalar_lea.hbm %s1329_s26, 256  ;;  %s1012_s15 = scalar_lea.hbm %s1395_s4, 512 }
 0x158   : > { %p1009_p3 = scmp.ne.s32.totalorder %s1329_s26, %s1008_s11  ;;  %p1013_p8 = scmp.lt.s32.totalorder %s1329_s26, %s1395_s4 }
 0x159   : > { %p1014_p11 = scmp.lt.s32.totalorder %s1012_s15, %s1008_s11 }
 0x15a   : > { %p1010_p4 = pnand %p1009_p3, %p1163_p5 }
 0x15b   : > { %p1015_p9 = por %p1014_p11, %p1013_p8 }
 0x15c   : > { %p1011_p7 = pneg %p1010_p4 }
 0x15e   : > { %p1016_p10 = pnand %p1015_p9, %p1011_p7 }
 0x160   : > { %1019 = shalt.err (!%p1016_p10)
}
 0x161   : > { %s1092_s23 = smov 128   ;;  %s1093_s25 = smov 8  }
 0x162   : > { %920 = dma.vmem_to_hbm [thread:$0]  (%p1163_p5), %s1331_s30, 256, %s1329_s26, %s679_s6, %s1092_s23, %s1092_s23, %s1093_s25  }
 0x163   : > { %s835_s7 = sshll.u32 %s1322_s14, 3  ;;  %s866_s8 = sshll.u32 %s1146_s22, 7 }
 0x164   : > { %s255_s9 = scalar_lea.vmem [#allocation6], %s835_s7  ;;  %s711_s6 = scalar_lea.hbm %s1396_s5, %s866_s8 }
 0x165   : > { %s713_s10 = sshll.u32 %s255_s9, 4  ;;  %s684_s11 = scalar_lea.sflag [#allocation7], %s1322_s14  ;;  %s714_s10 = int_to_ptr.vmem [resolvable:$true] %s713_s10 }
 0x166   : > { %s1020_s12 = scalar_lea.vmem %s714_s10, 128  ;;  %s1094_s13 = smov [#allocation6]  }
 0x167   : > { %p1021_p12 = scmp.ne.s32.totalorder %s714_s10, %s1020_s12  ;;  %s1024_s15 = sshll.u32 %s1094_s13, 4  ;;  %s1025_s15 = int_to_ptr.vmem [resolvable:$false] %s1024_s15 }
 0x168   : > { %s1026_s22 = scalar_lea.vmem %s1025_s15, 256  ;;  %p1027_p1 = scmp.lt.s32.totalorder %s714_s10, %s1025_s15 }
 0x169   : > { %p1022_p13 = pnand %p1021_p12, %p1163_p5  ;;  %p1028_p2 = scmp.lt.s32.totalorder %s1026_s22, %s1020_s12 }
 0x16b   : > { %p1023_p0 = pneg %p1022_p13  ;;  %p1029_p3 = por %p1028_p2, %p1027_p1 }
 0x16d   : > { %p1030_p4 = pnand %p1029_p3, %p1023_p0 }
 0x1d0   : > { %v647_v9 = vpop.xlane.xlu0 %646 }
 0x1d4   : > { %v649_v10 = vpop.xlane.xlu0 %648 }
 0x1d5   : > { %v650_v57 = vadd.f32 %v649_v10, %v647_v9 }
 0x1d7   : > { %v651_v11 = vrot.slane %v650_v57, 4 }
 0x1d9   : > { %v652_v13 = vadd.f32 %v651_v11, %v650_v57 }
 0x1db   : > { %v653_v3 = vrot.slane %v652_v13, 2 }
 0x1dd   : > { %v654_v14 = vadd.f32 %v653_v3, %v652_v13 }
 0x1de   : > { %v673_v16 = vpop.xlane.xlu1 %672 }
 0x1df   : > { %v655_v15 = vrot.slane %v654_v14, 1  ;;  %v675_v20 = vmul.f32 0.0001, %v673_v16 }
 0x1e1   : > { %v656_v17 = vadd.f32 %v655_v15, %v654_v14 }
 0x1e3   : > { %v674_v19 = vmul.f32 0.0625, %v656_v17 }
 0x1e5   : > { %v676_v41 = vadd.f32 %v675_v20, %v674_v19 }
 0x1e7   : > { %677 = vst [vmem:[%s255_s9] sm:$0xff] %v676_v41 }
 0x1e8   : > { %1033 = shalt.err (!%p1030_p4)
}
 0x1e9   : > { %s1034_s16 = scalar_lea.hbm %s711_s6, 128  ;;  %s1038_s23 = scalar_lea.hbm %s1396_s5, 256 }
 0x1ea   : > { %p1035_p7 = scmp.ne.s32.totalorder %s711_s6, %s1034_s16  ;;  %p1039_p9 = scmp.lt.s32.totalorder %s711_s6, %s1396_s5 }
 0x1eb   : > { %p1040_p10 = scmp.lt.s32.totalorder %s1038_s23, %s1034_s16 }
 0x1ec   : > { %p1036_p8 = pnand %p1035_p7, %p1163_p5 }
 0x1ed   : > { %p1041_p12 = por %p1040_p10, %p1039_p9 }
 0x1ee   : > { %p1037_p11 = pneg %p1036_p8 }
 0x1f0   : > { %p1042_p13 = pnand %p1041_p12, %p1037_p11 }
 0x1f2   : > { %1045 = shalt.err (!%p1042_p13)
}
 0x1f3   : > { %921 = dma.vmem_to_hbm [thread:$0]  (%p1163_p5), %s714_s10, 128, %s711_s6, %s684_s11  }
 0x1f4 PF: > { %p937_p0 = scmp.ge.s32.totalorder %s1088_s21, 2  ;;  %s725_s8 = sand.u32 1, %s1076_s18  }
 0x1f5   : > { %s726_s9 = scalar_lea.sflag [#allocation3], %s725_s8 }
 0x1f6   : > { %p929_p1 = pnand %p937_p0, %p1167_p6 }
 0x1f8   : > { %p930_p2 = pneg %p929_p1 }
 0x1fa   : > { %1067 = dma.done.wait (%p930_p2), %s726_s9, 256  }
 0x1fb   : > { %1069 = vsyncadd (%p930_p2), %s726_s9, 4294967040  ;;  %s735_s26 = scalar_lea.sflag [#allocation7], %s725_s8 }
 0x1fc   : > { %1071 = dma.done.wait (%p930_p2), %s735_s26, 128  }
 0x1fd   : > { %1073 = vsyncadd (%p930_p2), %s735_s26, 4294967168  ;;  %p20_p5 = scmp.ge.s32.totalorder %s1150_s24, 4   ;;  %s1400_s18 = smov %s1080_s19 }
 0x1fe   : > { %s1401_s19 = smov %s1084_s20  ;;  %s1402_s20 = smov %s1161_s27 }
 0x1ff   : > { %s1403_s21 = smov %s1150_s24  ;;  %22 = sbr.rel (!%p20_p5) target bundleno = 6 (0x6), region = 96 }
 0x204   :  { %740 = vsyncpa [#allocation3], 1 }
 0x205   :  { %742 = vsyncpa [#allocation3 + $0x1], 1 }
 0x206   :  { %743 = vsyncpa [#allocation7], 1 }
 0x207   :  { %745 = vsyncpa [#allocation7 + $0x1], 1 }
 0x208   :  { %746 = vsyncpa [#allocation4], 1 }
 0x209   :  { %748 = vsyncpa [#allocation4 + $0x1], 1 }

</bundles_post_ra>
